<compile_context>
chip_gen: v5e
topology: v5e:2x2
jax: 0.10.0
libtpu: 0.0.40
codegen_flags: <defaults>
</compile_context>

<pallas_src>
import functools
import math

import jax
import jax.numpy as jnp
from jax.experimental import pallas as pl
from jax.experimental.pallas import tpu as pltpu


def _lora_linear_kernel(x_ref, w_ref, a_ref, b_ref, bias_ref, o_ref, *, scale):
    # x_ref:    (tb,   d_in)
    # w_ref:    (d_in, tn)     frozen weight, pre-transposed
    # a_ref:    (d_in, r)      LoRA A, pre-transposed
    # b_ref:    (r,    tn)     LoRA B, pre-transposed
    # bias_ref: (1,    tn)
    # o_ref:    (tb,   tn)
    x = x_ref[...]

    # Base path: x @ W  -> (tb, tn).  Single f32 accumulator, updated in place.
    acc = jnp.dot(x, w_ref[...], preferred_element_type=jnp.float32)

    # LoRA path: fold `scale` into the tiny (tb, r) intermediate instead of the
    # (tb, tn) output tile.
    x_a = jnp.dot(x, a_ref[...], preferred_element_type=jnp.float32) * scale
    acc = acc + jnp.dot(x_a.astype(b_ref.dtype), b_ref[...],
                        preferred_element_type=jnp.float32)

    acc = acc + bias_ref[...].astype(jnp.float32)
    o_ref[...] = acc.astype(o_ref.dtype)


def _round_up(x, m):
    return ((x + m - 1) // m) * m


def lora_linear(x, weight, bias, A, B_lora, *, scale, block_b=None, block_n=None):
    """Fused LoRA linear forward.

    x:      [B, d_in]
    weight: [d_out, d_in]   (frozen)
    bias:   [d_out] or None
    A:      [r, d_in]
    B_lora: [d_out, r]
    returns [B, d_out]
    """
    Bsz, d_in = x.shape
    d_out, _ = weight.shape
    r = A.shape[0]

    # Pre-transpose once in the wrapper: contraction dim (d_in / r) lands on the
    # sublane axis of the RHS, so the MXU consumes operands without in-kernel
    # transposes.
    w_t = weight.T            # (d_in, d_out)
    a_t = A.T                 # (d_in, r)
    b_t = B_lora.T            # (r, d_out)

    if bias is None:
        bias = jnp.zeros((d_out,), dtype=x.dtype)

    # Tile defaults: batch tile multiple of 8 (f32 sublane), capped at 256;
    # d_out tile a multiple of 128 (lane-dense stores), capped at 256 to match
    # the 256-wide MXU on v6e/v7x while staying well inside VMEM.
    if block_b is None:
        block_b = min(256, _round_up(Bsz, 8))
    if block_n is None:
        block_n = min(256, _round_up(d_out, 128))

    Bp = _round_up(Bsz, block_b)
    Np = _round_up(d_out, block_n)

    if Bp != Bsz:
        x = jnp.pad(x, ((0, Bp - Bsz), (0, 0)))
    if Np != d_out:
        w_t = jnp.pad(w_t, ((0, 0), (0, Np - d_out)))
        b_t = jnp.pad(b_t, ((0, 0), (0, Np - d_out)))
        bias = jnp.pad(bias, (0, Np - d_out))

    bias2d = bias.reshape(1, Np)

    grid = (Bp // block_b, Np // block_n)

    kernel = functools.partial(_lora_linear_kernel, scale=scale)

    out = pl.pallas_call(
        kernel,
        out_shape=jax.ShapeDtypeStruct((Bp, Np), x.dtype),
        grid_spec=pltpu.PrefetchScalarGridSpec(
            num_scalar_prefetch=0,
            grid=grid,
            in_specs=[
                pl.BlockSpec((block_b, d_in), lambda i, j: (i, 0)),   # x (batch tile)
                pl.BlockSpec((d_in, block_n), lambda i, j: (0, j)),   # W^T (d_out tile)
                pl.BlockSpec((d_in, r),       lambda i, j: (0, 0)),   # A^T (resident)
                pl.BlockSpec((r, block_n),    lambda i, j: (0, j)),   # B^T (d_out tile)
                pl.BlockSpec((1, block_n),    lambda i, j: (0, j)),   # bias (d_out tile)
            ],
            out_specs=pl.BlockSpec((block_b, block_n), lambda i, j: (i, j)),
        ),
        compiler_params=pltpu.CompilerParams(
            dimension_semantics=("parallel", "parallel"),
            vmem_limit_bytes=64 * 1024 * 1024,
        ),
    )(x, w_t, a_t, b_t, bias2d)

    return out[:Bsz, :d_out]


def _kaiming_uniform(key, shape, a=math.sqrt(5), dtype=jnp.float32):
    # torch.nn.init.kaiming_uniform_ with fan_in = shape[1]
    fan_in = shape[1]
    gain = math.sqrt(2.0 / (1.0 + a * a))
    bound = gain * math.sqrt(3.0 / fan_in)
    return jax.random.uniform(key, shape, dtype=dtype, minval=-bound, maxval=bound)


if __name__ == "__main__":
    # Small shapes consistent with the module's forward: x [B, d_in].
    batch, d_in, d_out, rank = 8, 32, 64, 4
    alpha = 8
    scale = alpha / rank

    key = jax.random.PRNGKey(0)
    k_w, k_b, k_x, k_B = jax.random.split(key, 4)

    # Frozen base nn.Linear params (deterministic, synthetic).
    weight = _kaiming_uniform(k_w, (d_out, d_in))
    bias_bound = 1.0 / math.sqrt(d_in)
    bias = jax.random.uniform(k_b, (d_out,), minval=-bias_bound, maxval=bias_bound)

    # LoRA params: A initialized to zeros (as in the module), B kaiming-uniform.
    A = jnp.zeros((rank, d_in), dtype=jnp.float32)
    B_lora = _kaiming_uniform(k_B, (d_out, rank))
    # Give A a non-zero value so the LoRA path is actually exercised numerically.
    A = A + 0.01 * jax.random.normal(jax.random.PRNGKey(1), (rank, d_in))

    x = jax.random.normal(k_x, (batch, d_in), dtype=jnp.float32)

    y = lora_linear(x, weight, bias, A, B_lora, scale=scale)
    y = jax.block_until_ready(y)

    # Pure-JAX reference for verification.
    y_ref = (x @ weight.T) + scale * ((x @ A.T) @ B_lora.T) + bias[None, :]

    assert y.shape == (batch, d_out)
    assert jnp.allclose(y, y_ref, atol=1e-4, rtol=1e-4), "mismatch vs reference"

    print("KERNEL_OK")
</pallas_src>

<mosaic_0001>
module attributes {stable_mosaic.version = 11 : i64} {
  func.func @_lora_linear_kernel(%arg0: i32, %arg1: i32, %arg2: memref<8x32xf32, #tpu.memory_space<vmem>>, %arg3: memref<32x128xf32, #tpu.memory_space<vmem>>, %arg4: memref<32x4xf32, #tpu.memory_space<vmem>>, %arg5: memref<4x128xf32, #tpu.memory_space<vmem>>, %arg6: memref<1x128xf32, #tpu.memory_space<vmem>>, %arg7: memref<8x128xf32, #tpu.memory_space<vmem>>) attributes {dimension_semantics = [#tpu.dimension_semantics<parallel>, #tpu.dimension_semantics<parallel>], iteration_bounds = array<i64: 1, 1>, scalar_prefetch = 0 : i64, scratch_operands = 0 : i64, tpu.core_type = #tpu.core_type<tc>, window_params = [{transform_indices = @transform_0, window_bounds = array<i64: 8, 32>}, {transform_indices = @transform_1, window_bounds = array<i64: 32, 128>}, {pipeline_mode = #tpu.pipeline_mode<synchronous>, transform_indices = @transform_2, window_bounds = array<i64: 32, 4>}, {transform_indices = @transform_3, window_bounds = array<i64: 4, 128>}, {transform_indices = @transform_4, window_bounds = array<i64: 1, 128>}, {transform_indices = @transform_5, window_bounds = array<i64: 8, 128>}]} {
    %c0 = arith.constant 0 : index
    %c0_0 = arith.constant 0 : index
    %0 = vector.load %arg2[%c0, %c0_0] : memref<8x32xf32, #tpu.memory_space<vmem>>, vector<8x32xf32>
    %c0_1 = arith.constant 0 : index
    %c0_2 = arith.constant 0 : index
    %1 = vector.load %arg3[%c0_1, %c0_2] : memref<32x128xf32, #tpu.memory_space<vmem>>, vector<32x128xf32>
    %cst = arith.constant dense<0.000000e+00> : vector<8x128xf32>
    %2 = tpu.matmul %0, %1, %cst {dimension_numbers = #tpu.dot_dimension_numbers<[1], [0], [0], [1], [0, 0, 1, 1], [], []>} : vector<8x32xf32>, vector<32x128xf32>, vector<8x128xf32> -> vector<8x128xf32>
    %c0_3 = arith.constant 0 : index
    %c0_4 = arith.constant 0 : index
    %3 = vector.load %arg4[%c0_3, %c0_4] : memref<32x4xf32, #tpu.memory_space<vmem>>, vector<32x4xf32>
    %cst_5 = arith.constant dense<0.000000e+00> : vector<8x4xf32>
    %4 = tpu.matmul %0, %3, %cst_5 {dimension_numbers = #tpu.dot_dimension_numbers<[1], [0], [0], [1], [0, 0, 1, 1], [], []>} : vector<8x32xf32>, vector<32x4xf32>, vector<8x4xf32> -> vector<8x4xf32>
    %cst_6 = arith.constant 2.000000e+00 : f32
    %5 = vector.broadcast %cst_6 : f32 to vector<8x4xf32>
    %6 = arith.mulf %4, %5 : vector<8x4xf32>
    %c0_7 = arith.constant 0 : index
    %c0_8 = arith.constant 0 : index
    %7 = vector.load %arg5[%c0_7, %c0_8] : memref<4x128xf32, #tpu.memory_space<vmem>>, vector<4x128xf32>
    %cst_9 = arith.constant dense<0.000000e+00> : vector<8x128xf32>
    %8 = tpu.matmul %6, %7, %cst_9 {dimension_numbers = #tpu.dot_dimension_numbers<[1], [0], [0], [1], [0, 0, 1, 1], [], []>} : vector<8x4xf32>, vector<4x128xf32>, vector<8x128xf32> -> vector<8x128xf32>
    %9 = arith.addf %2, %8 : vector<8x128xf32>
    %c0_10 = arith.constant 0 : index
    %c0_11 = arith.constant 0 : index
    %10 = vector.load %arg6[%c0_10, %c0_11] : memref<1x128xf32, #tpu.memory_space<vmem>>, vector<1x128xf32>
    %11 = vector.broadcast %10 : vector<1x128xf32> to vector<8x128xf32>
    %12 = arith.addf %9, %11 : vector<8x128xf32>
    %c0_12 = arith.constant 0 : index
    %c0_13 = arith.constant 0 : index
    %13 = vector.load %arg7[%c0_12, %c0_13] : memref<8x128xf32, #tpu.memory_space<vmem>>, vector<8x128xf32>
    tpu.vector_store %arg7[%c0_12, %c0_13], %12 {strides = array<i32>} : memref<8x128xf32, #tpu.memory_space<vmem>>, vector<8x128xf32>,
    return
  }
  func.func @transform_0(%arg0: i32, %arg1: i32) -> (i32, i32) {
    %c0_i32 = arith.constant 0 : i32
    %c0_i32_0 = arith.constant 0 : i32
    return %arg0, %c0_i32 : i32, i32
  }
  func.func @transform_1(%arg0: i32, %arg1: i32) -> (i32, i32) {
    %c0_i32 = arith.constant 0 : i32
    %c0_i32_0 = arith.constant 0 : i32
    return %c0_i32, %arg1 : i32, i32
  }
  func.func @transform_2(%arg0: i32, %arg1: i32) -> (i32, i32) {
    %c0_i32 = arith.constant 0 : i32
    %c0_i32_0 = arith.constant 0 : i32
    %c0_i32_1 = arith.constant 0 : i32
    return %c0_i32, %c0_i32_0 : i32, i32
  }
  func.func @transform_3(%arg0: i32, %arg1: i32) -> (i32, i32) {
    %c0_i32 = arith.constant 0 : i32
    %c0_i32_0 = arith.constant 0 : i32
    return %c0_i32, %arg1 : i32, i32
  }
  func.func @transform_4(%arg0: i32, %arg1: i32) -> (i32, i32) {
    %c0_i32 = arith.constant 0 : i32
    %c0_i32_0 = arith.constant 0 : i32
    return %c0_i32, %arg1 : i32, i32
  }
  func.func @transform_5(%arg0: i32, %arg1: i32) -> (i32, i32) {
    %c0_i32 = arith.constant 0 : i32
    return %arg0, %arg1 : i32, i32
  }
}

</mosaic_0001>

<bundles_post_ra>
// kernel: tpu_custom_call.1
= control target key start
LH: loop header
LB: loop body
LE: loop exit
PB: predicated region body
PF: predicated region fallthrough
CT: control target
= control target key end

     0   :  { %10 = vsyncpa [#allocation3], 0  ;;  %s268_s0 = inlined_call_operand.hbm [shape: f32[8,32], index: 0, kind: input, shape index: {}]   ;;  %s269_s1 = inlined_call_operand.vmem [shape: f32[32,128], index: 1, kind: input, shape index: {}]   ;;  %s270_s2 = inlined_call_operand.vmem [shape: f32[32,4], index: 2, kind: input, shape index: {}]   ;;  %s271_s3 = inlined_call_operand.vmem [shape: f32[4,128], index: 3, kind: input, shape index: {}]   ;;  %s272_s4 = inlined_call_operand.vmem [shape: f32[1,128], index: 4, kind: input, shape index: {}]   ;;  %s273_s5 = inlined_call_operand.hbm [shape: f32[8,128], index: 5, kind: output, shape index: {}]  }
   0x1   :  { %11 = vsyncpa [#allocation4], 0  ;;  %s17_s20 = sshll.u32 %s268_s0, 4  ;;  %s200_s21 = smov [#allocation2]   ;;  %s18_s20 = int_to_ptr.hbm [resolvable:$true] %s17_s20 }
   0x2   :  { %s19_s22 = sshll.u32 %s200_s21, 4  ;;  %s20_s22 = int_to_ptr.vmem [resolvable:$true] %s19_s22 }
   0x3   :  { %22 = dma.hbm_to_vmem [thread:$0]  %s18_s20, 128, %s20_s22, [#allocation3]  }
   0x4   :  { %196 = dma.done.wait [#allocation3], 128  }
   0x5   :  { %197 = vsyncadd [#allocation3], 4294967168  ;;  %v43_v0 = vld [vmem:[%s270_s2 + $0x18] sm:$0xff]  ;;  %v42_v1 = vld [vmem:[%s270_s2 + $0x10] sm:$0xff]  ;;  %vm44_vm0 = vcmask 261120   ;;  %vm74_vm1 = vcmask 1043456  }
   0x6   :  { %60 = vmatpush.msra.mxu0 %v43_v0  ;;  %v39_v2 = vld [vmem:[%s269_s1 + $0x18] sm:$0xff]  ;;  %v41_v3 = vld [vmem:[%s270_s2 + $0x8] sm:$0xff]  ;;  %v38_v4 = vld [vmem:[%s269_s1 + $0x10] sm:$0xff]  ;;  %vm70_vm2 = vcmask 31744   ;;  %s131_s19 = sshll.u32 %s273_s5, 4  ;;  %s132_s19 = int_to_ptr.hbm [resolvable:$true] %s131_s19 }
   0x7   :  { %110 = vmatpush.msra.mxu2 %v39_v2  ;;  %v37_v5 = vld [vmem:[%s269_s1 + $0x8] sm:$0xff]  ;;  %v40_v6 = vld [vmem:[%s270_s2] sm:$0xff] }
   0x8   :  { %61 = vmatpush.msra.mxu0 %v42_v1  ;;  %v35_v7 = vld [vmem:[#allocation2] sm:$0xff] }
   0x9   :  { %111 = vmatpush.msra.mxu2 %v38_v4  ;;  %v36_v8 = vld [vmem:[%s269_s1] sm:$0xff]  ;;  %s201_s1 = smov [#allocation5]  }
   0xa   :  { %62 = vmatpush.msra.mxu0 %v41_v3  ;;  %v69_v9 = vld [vmem:[%s271_s3] sm:$0xf]  ;;  %s129_s16 = sshll.u32 %s201_s1, 4  ;;  %s130_s16 = int_to_ptr.vmem [resolvable:$true] %s129_s16 }
   0xb   :  { %112 = vmatpush.msra.mxu2 %v37_v5  ;;  %142 = vmatpush.msk.msra.mxu1 %vm74_vm1, %v69_v9  ;;  %v147_v13 = vld [vmem:[%s272_s4] ss:$0 sm:$0xff] }
   0xc   :  { %63 = vmatpush.msra.mxu0 %v40_v6 }
   0xd   :  { %141 = vmatmul.msk.f32.vlgmr.msra.gmra.mxu0 %vm44_vm0, %v35_v7  ;;  %113 = vmatpush.msra.mxu2 %v36_v8 }
   0xe   :  { %144 = vmatmul.msk.f32.vlgmr.msra.gmra.mxu2 %vm44_vm0, %v35_v7 }
  0x8a   :  { %v65_v10 = vpop.f32.mrf.mxu0 }
  0x8b   :  { %v68_v11 = vmul.f32 2.0, %v65_v10 }
  0x8d   :  { %143 = vmatmul.msk.f32.vlgmr.msra.gmra.mxu1 %vm70_vm2, %v68_v11 }
  0x91   :  { %v115_v12 = vpop.f32.mrf.mxu2 }
 0x10a   :  { %v95_v14 = vpop.f32.mrf.mxu1 }
 0x10b   :  { %v116_v15 = vadd.f32 %v115_v12, %v95_v14 }
 0x10d   :  { %v122_v16 = vadd.f32 %v147_v13, %v116_v15 }
 0x10f   :  { %123 = vst [vmem:[#allocation5] sm:$0xff] %v122_v16 }
 0x110   :  { %134 = dma.vmem_to_hbm [thread:$0]  %s130_s16, 128, %s132_s19, [#allocation4]  }
 0x111   :  { %198 = dma.done.wait [#allocation4], 128  }
 0x112   :  { %199 = vsyncadd [#allocation4], 4294967168 }
 0x113   :  { %139 = vsyncpa [#allocation3], 1 }
 0x114   :  { %140 = vsyncpa [#allocation4], 1 }

</bundles_post_ra>
